<compile_context>
chip_gen: v6e
topology: v6e:2x2x1
jax: 0.10.0
libtpu: 0.0.40
codegen_flags: <defaults>
</compile_context>

<pallas_src>
import jax
import jax.numpy as jnp
from jax.experimental import pallas as pl
from jax.experimental.pallas import tpu as pltpu


_TB_MAX = 2048  # batch-tile rows; sized for v7x's 64 MiB VMEM


def _round_up(x, m):
    return ((x + m - 1) // m) * m


def _mlp_kernel(asv_enr_ref, asv_tst_ref, cm_tst_ref,
                w1e_ref, w1t_ref, w1c_ref, b1_ref,
                w2_ref, b2_ref, w3_ref, b3_ref, wo_ref,
                o_ref):
    """Fused MLP: 3x (Linear + LeakyReLU(0.3)) -> Linear(no bias) -> sigmoid."""
    slope = jnp.float32(0.3)
    f32 = jnp.float32
    bf16 = jnp.bfloat16

    def leaky(h):
        return jnp.where(h > 0, h, slope * h)

    # ---- Layer 1: concat fused as split-K partial dots against the three
    # resident row-blocks of w1.  bf16 operands, f32 accumulation.
    h1 = jnp.dot(asv_enr_ref[...].astype(bf16), w1e_ref[...],
                 preferred_element_type=f32)
    h1 = h1 + jnp.dot(asv_tst_ref[...].astype(bf16), w1t_ref[...],
                      preferred_element_type=f32)
    h1 = h1 + jnp.dot(cm_tst_ref[...].astype(bf16), w1c_ref[...],
                      preferred_element_type=f32)
    h1 = leaky(h1 + b1_ref[...])                                   # (TB, 256) f32

    # ---- Layers 2 & 3 (bf16 operands, f32 accumulation, f32 epilogue).
    h2 = leaky(jnp.dot(h1.astype(bf16), w2_ref[...],
                       preferred_element_type=f32) + b2_ref[...])  # (TB, 128) f32
    h3 = leaky(jnp.dot(h2.astype(bf16), w3_ref[...],
                       preferred_element_type=f32) + b3_ref[...])  # (TB, 64) f32

    # ---- Output projection (out_features == 1), lane-dense:
    # (1, n3) contracted with (TB, n3) over n3 -> (1, TB), i.e. the result is
    # produced directly with the batch on lanes (q @ k.T-style matmul, f32).
    logit = jax.lax.dot_general(
        wo_ref[...], h3,
        dimension_numbers=(((1,), (1,)), ((), ())),
        preferred_element_type=f32)                                # (1, TB)
    row = jax.nn.sigmoid(logit)
    # Sublane-broadcast to the (8, TB) output block -> full unmasked stores.
    o_ref[...] = jnp.broadcast_to(row, o_ref.shape)


@jax.jit
def baseline2_forward(embd_asv_enr, embd_asv_tst, embd_cm_tst, params):
    """Forward pass matching the PyTorch Baseline2 module."""
    asv_enr = jnp.squeeze(embd_asv_enr, axis=1)      # (B, 192)
    asv_tst = jnp.squeeze(embd_asv_tst, axis=1)      # (B, 192)
    cm_tst = jnp.squeeze(embd_cm_tst, axis=1)        # (B, 160)

    w1, b1, w2, b2, w3, b3, wo = params

    B = asv_enr.shape[0]
    d_enr, d_tst, d_cm = asv_enr.shape[1], asv_tst.shape[1], cm_tst.shape[1]
    n1, n2, n3 = w1.shape[1], w2.shape[1], w3.shape[1]
    d_in = d_enr + d_tst + d_cm

    # bf16 MXU operands (one-time cast; weights are resident in VMEM).  w1 is
    # pre-split so the kernel consumes whole blocks instead of row slices.
    bf16 = jnp.bfloat16
    w1e = w1[:d_enr].astype(bf16)
    w1t = w1[d_enr:d_enr + d_tst].astype(bf16)
    w1c = w1[d_enr + d_tst:].astype(bf16)
    w2b = w2.astype(bf16)
    w3b = w3.astype(bf16)
    # Output projection stays f32 (tiny flops; done as (1, n3) x h3^T).
    wo_row = wo.reshape(1, n3)

    # Batch tile: multiple of 8 (sublane), capped for VMEM headroom on v7x.
    TB = min(_TB_MAX, _round_up(B, 8))
    n_tiles = pl.cdiv(B, TB)
    grid = (n_tiles,)

    weight_elems = d_in * n1 + n1 + n1 * n2 + n2 + n2 * n3 + n3 + n3
    cost = pl.CostEstimate(
        flops=2 * B * (d_in * n1 + n1 * n2 + n2 * n3 + n3),
        transcendentals=B,                           # sigmoid
        bytes_accessed=4 * B * d_in + 2 * weight_elems + 4 * 8 * n_tiles * TB,
    )

    out = pl.pallas_call(
        _mlp_kernel,
        # Lane-dense output: 8 identical sublane rows x (n_tiles*TB) lanes.
        out_shape=jax.ShapeDtypeStruct((8, n_tiles * TB), jnp.float32),
        grid=grid,
        in_specs=[
            # Activation tiles: streamed / double-buffered over the batch.
            pl.BlockSpec((TB, d_enr), lambda i: (i, 0)),
            pl.BlockSpec((TB, d_tst), lambda i: (i, 0)),
            pl.BlockSpec((TB, d_cm), lambda i: (i, 0)),
            # Weights & biases: constant index_map -> DMA'd once, resident.
            pl.BlockSpec(w1e.shape, lambda i: (0, 0)),
            pl.BlockSpec(w1t.shape, lambda i: (0, 0)),
            pl.BlockSpec(w1c.shape, lambda i: (0, 0)),
            pl.BlockSpec(b1.shape, lambda i: (0, 0)),
            pl.BlockSpec(w2b.shape, lambda i: (0, 0)),
            pl.BlockSpec(b2.shape, lambda i: (0, 0)),
            pl.BlockSpec(w3b.shape, lambda i: (0, 0)),
            pl.BlockSpec(b3.shape, lambda i: (0, 0)),
            pl.BlockSpec((1, n3), lambda i: (0, 0)),
        ],
        out_specs=pl.BlockSpec((8, TB), lambda i: (0, i)),
        compiler_params=pltpu.CompilerParams(
            dimension_semantics=("parallel",),
            vmem_limit_bytes=48 * 1024 * 1024,
        ),
        cost_estimate=cost,
    )(asv_enr, asv_tst, cm_tst, w1e, w1t, w1c, b1, w2b, b2, w3b, b3, wo_row)

    # Row 0 holds the (lane-dense) logits for all tiles; restore (B, 1).
    return out[0, :B].reshape(B, 1)


def init_params(key, in_dim=544, num_nodes=(256, 128, 64)):
    """Deterministic PyTorch-like init: U(-1/sqrt(fan_in), +1/sqrt(fan_in))."""
    dims = [in_dim] + list(num_nodes)
    keys = jax.random.split(key, 2 * len(num_nodes) + 1)
    params = []
    for i in range(len(num_nodes)):
        fan_in = dims[i]
        bound = 1.0 / jnp.sqrt(jnp.float32(fan_in))
        w = jax.random.uniform(keys[2 * i], (dims[i], dims[i + 1]),
                               jnp.float32, -bound, bound)
        b = jax.random.uniform(keys[2 * i + 1], (1, dims[i + 1]),
                               jnp.float32, -bound, bound)
        params.extend([w, b])
    bound = 1.0 / jnp.sqrt(jnp.float32(num_nodes[-1]))
    wo = jax.random.uniform(keys[-1], (num_nodes[-1], 1),
                            jnp.float32, -bound, bound)
    params.append(wo)
    return tuple(params)


def reference_forward(embd_asv_enr, embd_asv_tst, embd_cm_tst, params,
                      matmul_dtype=jnp.float32):
    """Pure-JAX reference matching the PyTorch forward.

    matmul_dtype lets us mimic the kernel's bf16-operand / f32-accumulate
    hidden-layer matmuls for a tight logic check.  The output projection is
    kept in f32 (as in the kernel).
    """
    w1, b1, w2, b2, w3, b3, wo = params
    x = jnp.concatenate([jnp.squeeze(embd_asv_enr, 1),
                         jnp.squeeze(embd_asv_tst, 1),
                         jnp.squeeze(embd_cm_tst, 1)], axis=1)

    def leaky(h):
        return jnp.where(h > 0, h, 0.3 * h)

    def mm(a, w):
        return jnp.dot(a.astype(matmul_dtype), w.astype(matmul_dtype),
                       preferred_element_type=jnp.float32)

    h = leaky(mm(x, w1) + b1)
    h = leaky(mm(h, w2) + b2)
    h = leaky(mm(h, w3) + b3)
    return jax.nn.sigmoid(jnp.dot(h, wo, preferred_element_type=jnp.float32))


if __name__ == "__main__":
    key = jax.random.PRNGKey(0)
    k_p, k1, k2, k3 = jax.random.split(key, 4)

    B = 8
    # 544 = 192 (ASV enroll) + 192 (ASV test) + 160 (CM test)
    embd_asv_enr = jax.random.normal(k1, (B, 1, 192), jnp.float32)
    embd_asv_tst = jax.random.normal(k2, (B, 1, 192), jnp.float32)
    embd_cm_tst = jax.random.normal(k3, (B, 1, 160), jnp.float32)

    params = init_params(k_p)

    out = baseline2_forward(embd_asv_enr, embd_asv_tst, embd_cm_tst, params)
    out = jax.block_until_ready(out)
    assert out.shape == (B, 1)

    # Tight check against a bf16-matmul / f32-accumulate reference (logic).
    ref_bf16 = reference_forward(embd_asv_enr, embd_asv_tst, embd_cm_tst,
                                 params, matmul_dtype=jnp.bfloat16)
    assert jnp.allclose(out, ref_bf16, atol=1e-3, rtol=1e-3)

    # Loose check against the pure-f32 PyTorch-equivalent reference
    # (documents the deliberate bf16 precision trade).
    ref_f32 = reference_forward(embd_asv_enr, embd_asv_tst, embd_cm_tst, params)
    assert jnp.allclose(out, ref_f32, atol=2e-2, rtol=2e-2)

    print("KERNEL_OK")
</pallas_src>

<mosaic_0001>
module attributes {stable_mosaic.version = 11 : i64} {
  func.func @_mlp_kernel(%arg0: i32, %arg1: memref<8x192xf32, #tpu.memory_space<vmem>>, %arg2: memref<8x192xf32, #tpu.memory_space<vmem>>, %arg3: memref<8x160xf32, #tpu.memory_space<vmem>>, %arg4: memref<192x256xbf16, #tpu.memory_space<vmem>>, %arg5: memref<192x256xbf16, #tpu.memory_space<vmem>>, %arg6: memref<160x256xbf16, #tpu.memory_space<vmem>>, %arg7: memref<1x256xf32, #tpu.memory_space<vmem>>, %arg8: memref<256x128xbf16, #tpu.memory_space<vmem>>, %arg9: memref<1x128xf32, #tpu.memory_space<vmem>>, %arg10: memref<128x64xbf16, #tpu.memory_space<vmem>>, %arg11: memref<1x64xf32, #tpu.memory_space<vmem>>, %arg12: memref<1x64xf32, #tpu.memory_space<vmem>>, %arg13: memref<8x8xf32, #tpu.memory_space<vmem>>) attributes {dimension_semantics = [#tpu.dimension_semantics<parallel>], iteration_bounds = array<i64: 1>, scalar_prefetch = 0 : i64, scratch_operands = 0 : i64, tpu.core_type = #tpu.core_type<tc>, window_params = [{transform_indices = @transform_0, window_bounds = array<i64: 8, 192>}, {transform_indices = @transform_1, window_bounds = array<i64: 8, 192>}, {transform_indices = @transform_2, window_bounds = array<i64: 8, 160>}, {pipeline_mode = #tpu.pipeline_mode<synchronous>, transform_indices = @transform_3, window_bounds = array<i64: 192, 256>}, {pipeline_mode = #tpu.pipeline_mode<synchronous>, transform_indices = @transform_4, window_bounds = array<i64: 192, 256>}, {pipeline_mode = #tpu.pipeline_mode<synchronous>, transform_indices = @transform_5, window_bounds = array<i64: 160, 256>}, {pipeline_mode = #tpu.pipeline_mode<synchronous>, transform_indices = @transform_6, window_bounds = array<i64: 1, 256>}, {pipeline_mode = #tpu.pipeline_mode<synchronous>, transform_indices = @transform_7, window_bounds = array<i64: 256, 128>}, {pipeline_mode = #tpu.pipeline_mode<synchronous>, transform_indices = @transform_8, window_bounds = array<i64: 1, 128>}, {pipeline_mode = #tpu.pipeline_mode<synchronous>, transform_indices = @transform_9, window_bounds = array<i64: 128, 64>}, {pipeline_mode = #tpu.pipeline_mode<synchronous>, transform_indices = @transform_10, window_bounds = array<i64: 1, 64>}, {pipeline_mode = #tpu.pipeline_mode<synchronous>, transform_indices = @transform_11, window_bounds = array<i64: 1, 64>}, {transform_indices = @transform_12, window_bounds = array<i64: 8, 8>}]} {
    %c0 = arith.constant 0 : index
    %c0_0 = arith.constant 0 : index
    %0 = vector.load %arg1[%c0, %c0_0] : memref<8x192xf32, #tpu.memory_space<vmem>>, vector<8x192xf32>
    %1 = arith.truncf %0 : vector<8x192xf32> to vector<8x192xbf16>
    %c0_1 = arith.constant 0 : index
    %c0_2 = arith.constant 0 : index
    %2 = vector.load %arg4[%c0_1, %c0_2] : memref<192x256xbf16, #tpu.memory_space<vmem>>, vector<192x256xbf16>
    %cst = arith.constant dense<0.000000e+00> : vector<8x256xf32>
    %3 = tpu.matmul %1, %2, %cst {dimension_numbers = #tpu.dot_dimension_numbers<[1], [0], [0], [1], [0, 0, 1, 1], [], []>} : vector<8x192xbf16>, vector<192x256xbf16>, vector<8x256xf32> -> vector<8x256xf32>
    %c0_3 = arith.constant 0 : index
    %c0_4 = arith.constant 0 : index
    %4 = vector.load %arg2[%c0_3, %c0_4] : memref<8x192xf32, #tpu.memory_space<vmem>>, vector<8x192xf32>
    %5 = arith.truncf %4 : vector<8x192xf32> to vector<8x192xbf16>
    %c0_5 = arith.constant 0 : index
    %c0_6 = arith.constant 0 : index
    %6 = vector.load %arg5[%c0_5, %c0_6] : memref<192x256xbf16, #tpu.memory_space<vmem>>, vector<192x256xbf16>
    %cst_7 = arith.constant dense<0.000000e+00> : vector<8x256xf32>
    %7 = tpu.matmul %5, %6, %cst_7 {dimension_numbers = #tpu.dot_dimension_numbers<[1], [0], [0], [1], [0, 0, 1, 1], [], []>} : vector<8x192xbf16>, vector<192x256xbf16>, vector<8x256xf32> -> vector<8x256xf32>
    %8 = arith.addf %3, %7 : vector<8x256xf32>
    %c0_8 = arith.constant 0 : index
    %c0_9 = arith.constant 0 : index
    %9 = vector.load %arg3[%c0_8, %c0_9] : memref<8x160xf32, #tpu.memory_space<vmem>>, vector<8x160xf32>
    %10 = arith.truncf %9 : vector<8x160xf32> to vector<8x160xbf16>
    %c0_10 = arith.constant 0 : index
    %c0_11 = arith.constant 0 : index
    %11 = vector.load %arg6[%c0_10, %c0_11] : memref<160x256xbf16, #tpu.memory_space<vmem>>, vector<160x256xbf16>
    %cst_12 = arith.constant dense<0.000000e+00> : vector<8x256xf32>
    %12 = tpu.matmul %10, %11, %cst_12 {dimension_numbers = #tpu.dot_dimension_numbers<[1], [0], [0], [1], [0, 0, 1, 1], [], []>} : vector<8x160xbf16>, vector<160x256xbf16>, vector<8x256xf32> -> vector<8x256xf32>
    %13 = arith.addf %8, %12 : vector<8x256xf32>
    %c0_13 = arith.constant 0 : index
    %c0_14 = arith.constant 0 : index
    %14 = vector.load %arg7[%c0_13, %c0_14] : memref<1x256xf32, #tpu.memory_space<vmem>>, vector<1x256xf32>
    %15 = vector.broadcast %14 : vector<1x256xf32> to vector<8x256xf32>
    %16 = arith.addf %13, %15 : vector<8x256xf32>
    %cst_15 = arith.constant 0.000000e+00 : f32
    %17 = vector.broadcast %cst_15 : f32 to vector<8x256xf32>
    %18 = arith.cmpf ogt, %16, %17 : vector<8x256xf32>
    %cst_16 = arith.constant 3.000000e-01 : f32
    %19 = vector.broadcast %cst_16 : f32 to vector<8x256xf32>
    %20 = arith.mulf %19, %16 : vector<8x256xf32>
    %21 = arith.select %18, %16, %20 : vector<8x256xi1>, vector<8x256xf32>
    %22 = arith.truncf %21 : vector<8x256xf32> to vector<8x256xbf16>
    %c0_17 = arith.constant 0 : index
    %c0_18 = arith.constant 0 : index
    %23 = vector.load %arg8[%c0_17, %c0_18] : memref<256x128xbf16, #tpu.memory_space<vmem>>, vector<256x128xbf16>
    %cst_19 = arith.constant dense<0.000000e+00> : vector<8x128xf32>
    %24 = tpu.matmul %22, %23, %cst_19 {dimension_numbers = #tpu.dot_dimension_numbers<[1], [0], [0], [1], [0, 0, 1, 1], [], []>} : vector<8x256xbf16>, vector<256x128xbf16>, vector<8x128xf32> -> vector<8x128xf32>
    %c0_20 = arith.constant 0 : index
    %c0_21 = arith.constant 0 : index
    %25 = vector.load %arg9[%c0_20, %c0_21] : memref<1x128xf32, #tpu.memory_space<vmem>>, vector<1x128xf32>
    %26 = vector.broadcast %25 : vector<1x128xf32> to vector<8x128xf32>
    %27 = arith.addf %24, %26 : vector<8x128xf32>
    %cst_22 = arith.constant 0.000000e+00 : f32
    %28 = vector.broadcast %cst_22 : f32 to vector<8x128xf32>
    %29 = arith.cmpf ogt, %27, %28 : vector<8x128xf32>
    %cst_23 = arith.constant 3.000000e-01 : f32
    %30 = vector.broadcast %cst_23 : f32 to vector<8x128xf32>
    %31 = arith.mulf %30, %27 : vector<8x128xf32>
    %32 = arith.select %29, %27, %31 : vector<8x128xi1>, vector<8x128xf32>
    %33 = arith.truncf %32 : vector<8x128xf32> to vector<8x128xbf16>
    %c0_24 = arith.constant 0 : index
    %c0_25 = arith.constant 0 : index
    %34 = vector.load %arg10[%c0_24, %c0_25] : memref<128x64xbf16, #tpu.memory_space<vmem>>, vector<128x64xbf16>
    %cst_26 = arith.constant dense<0.000000e+00> : vector<8x64xf32>
    %35 = tpu.matmul %33, %34, %cst_26 {dimension_numbers = #tpu.dot_dimension_numbers<[1], [0], [0], [1], [0, 0, 1, 1], [], []>} : vector<8x128xbf16>, vector<128x64xbf16>, vector<8x64xf32> -> vector<8x64xf32>
    %c0_27 = arith.constant 0 : index
    %c0_28 = arith.constant 0 : index
    %36 = vector.load %arg11[%c0_27, %c0_28] : memref<1x64xf32, #tpu.memory_space<vmem>>, vector<1x64xf32>
    %37 = vector.broadcast %36 : vector<1x64xf32> to vector<8x64xf32>
    %38 = arith.addf %35, %37 : vector<8x64xf32>
    %cst_29 = arith.constant 0.000000e+00 : f32
    %39 = vector.broadcast %cst_29 : f32 to vector<8x64xf32>
    %40 = arith.cmpf ogt, %38, %39 : vector<8x64xf32>
    %cst_30 = arith.constant 3.000000e-01 : f32
    %41 = vector.broadcast %cst_30 : f32 to vector<8x64xf32>
    %42 = arith.mulf %41, %38 : vector<8x64xf32>
    %43 = arith.select %40, %38, %42 : vector<8x64xi1>, vector<8x64xf32>
    %c0_31 = arith.constant 0 : index
    %c0_32 = arith.constant 0 : index
    %44 = vector.load %arg12[%c0_31, %c0_32] : memref<1x64xf32, #tpu.memory_space<vmem>>, vector<1x64xf32>
    %cst_33 = arith.constant dense<0.000000e+00> : vector<1x8xf32>
    %45 = tpu.matmul %44, %43, %cst_33 {dimension_numbers = #tpu.dot_dimension_numbers<[1], [1], [0], [0], [0, 0, 1, 0], [], []>} : vector<1x64xf32>, vector<8x64xf32>, vector<1x8xf32> -> vector<1x8xf32>
    %46 = arith.negf %45 : vector<1x8xf32>
    %47 = math.exp %46 : vector<1x8xf32>
    %cst_34 = arith.constant 1.000000e+00 : f32
    %48 = vector.broadcast %cst_34 : f32 to vector<1x8xf32>
    %49 = arith.addf %48, %47 : vector<1x8xf32>
    %50 = arith.divf %48, %49 : vector<1x8xf32>
    %51 = vector.shape_cast %50 : vector<1x8xf32> to vector<1x8xf32>
    %52 = vector.broadcast %51 : vector<1x8xf32> to vector<8x8xf32>
    %c0_35 = arith.constant 0 : index
    %c0_36 = arith.constant 0 : index
    %53 = vector.load %arg13[%c0_35, %c0_36] : memref<8x8xf32, #tpu.memory_space<vmem>>, vector<8x8xf32>
    tpu.vector_store %arg13[%c0_35, %c0_36], %52 {strides = array<i32>} : memref<8x8xf32, #tpu.memory_space<vmem>>, vector<8x8xf32>,
    return
  }
  func.func @transform_0(%arg0: i32) -> (i32, i32) {
    %c0_i32 = arith.constant 0 : i32
    %c0_i32_0 = arith.constant 0 : i32
    return %arg0, %c0_i32 : i32, i32
  }
  func.func @transform_1(%arg0: i32) -> (i32, i32) {
    %c0_i32 = arith.constant 0 : i32
    %c0_i32_0 = arith.constant 0 : i32
    return %arg0, %c0_i32 : i32, i32
  }
  func.func @transform_2(%arg0: i32) -> (i32, i32) {
    %c0_i32 = arith.constant 0 : i32
    %c0_i32_0 = arith.constant 0 : i32
    return %arg0, %c0_i32 : i32, i32
  }
  func.func @transform_3(%arg0: i32) -> (i32, i32) {
    %c0_i32 = arith.constant 0 : i32
    %c0_i32_0 = arith.constant 0 : i32
    %c0_i32_1 = arith.constant 0 : i32
    return %c0_i32, %c0_i32_0 : i32, i32
  }
  func.func @transform_4(%arg0: i32) -> (i32, i32) {
    %c0_i32 = arith.constant 0 : i32
    %c0_i32_0 = arith.constant 0 : i32
    %c0_i32_1 = arith.constant 0 : i32
    return %c0_i32, %c0_i32_0 : i32, i32
  }
  func.func @transform_5(%arg0: i32) -> (i32, i32) {
    %c0_i32 = arith.constant 0 : i32
    %c0_i32_0 = arith.constant 0 : i32
    %c0_i32_1 = arith.constant 0 : i32
    return %c0_i32, %c0_i32_0 : i32, i32
  }
  func.func @transform_6(%arg0: i32) -> (i32, i32) {
    %c0_i32 = arith.constant 0 : i32
    %c0_i32_0 = arith.constant 0 : i32
    %c0_i32_1 = arith.constant 0 : i32
    return %c0_i32, %c0_i32_0 : i32, i32
  }
  func.func @transform_7(%arg0: i32) -> (i32, i32) {
    %c0_i32 = arith.constant 0 : i32
    %c0_i32_0 = arith.constant 0 : i32
    %c0_i32_1 = arith.constant 0 : i32
    return %c0_i32, %c0_i32_0 : i32, i32
  }
  func.func @transform_8(%arg0: i32) -> (i32, i32) {
    %c0_i32 = arith.constant 0 : i32
    %c0_i32_0 = arith.constant 0 : i32
    %c0_i32_1 = arith.constant 0 : i32
    return %c0_i32, %c0_i32_0 : i32, i32
  }
  func.func @transform_9(%arg0: i32) -> (i32, i32) {
    %c0_i32 = arith.constant 0 : i32
    %c0_i32_0 = arith.constant 0 : i32
    %c0_i32_1 = arith.constant 0 : i32
    return %c0_i32, %c0_i32_0 : i32, i32
  }
  func.func @transform_10(%arg0: i32) -> (i32, i32) {
    %c0_i32 = arith.constant 0 : i32
    %c0_i32_0 = arith.constant 0 : i32
    %c0_i32_1 = arith.constant 0 : i32
    return %c0_i32, %c0_i32_0 : i32, i32
  }
  func.func @transform_11(%arg0: i32) -> (i32, i32) {
    %c0_i32 = arith.constant 0 : i32
    %c0_i32_0 = arith.constant 0 : i32
    %c0_i32_1 = arith.constant 0 : i32
    return %c0_i32, %c0_i32_0 : i32, i32
  }
  func.func @transform_12(%arg0: i32) -> (i32, i32) {
    %c0_i32 = arith.constant 0 : i32
    %c0_i32_0 = arith.constant 0 : i32
    return %c0_i32, %arg0 : i32, i32
  }
}

</mosaic_0001>

<bundles_post_ra>
// kernel: baseline2_forward.1
= control target key start
LH: loop header
LB: loop body
LE: loop exit
PB: predicated region body
PF: predicated region fallthrough
CT: control target
= control target key end

     0   :  { %vm218_vm0 = vcmask 523264   ;;  %vm551_vm1 = vcmask 261120   ;;  %vm1297_vm4 = vmmov 0   ;;  %vm1000_vm7 = vcmask 64512   ;;  %s1695_s4 = inlined_call_operand.vmem [shape: bf16[192,256], index: 4, kind: input, shape index: {}]   ;;  %s1696_s3 = inlined_call_operand.vmem [shape: bf16[192,256], index: 3, kind: input, shape index: {}]   ;;  %s1697_s1 = inlined_call_operand.vmem [shape: f32[8,192], index: 1, kind: input, shape index: {}]   ;;  %s1698_s0 = inlined_call_operand.vmem [shape: f32[8,192], index: 0, kind: input, shape index: {}]   ;;  %s1699_s5 = inlined_call_operand.vmem [shape: bf16[160,256], index: 5, kind: input, shape index: {}]   ;;  %s1700_s2 = inlined_call_operand.vmem [shape: f32[8,160], index: 2, kind: input, shape index: {}]   ;;  %s1701_s7 = inlined_call_operand.vmem [shape: bf16[256,128], index: 7, kind: input, shape index: {}]   ;;  %s1702_s9 = inlined_call_operand.vmem [shape: bf16[128,64], index: 9, kind: input, shape index: {}]   ;;  %s1703_s6 = inlined_call_operand.vmem [shape: f32[1,256], index: 6, kind: input, shape index: {}]   ;;  %s1704_s8 = inlined_call_operand.vmem [shape: f32[1,128], index: 8, kind: input, shape index: {}]   ;;  %s1705_s10 = inlined_call_operand.vmem [shape: f32[1,64], index: 10, kind: input, shape index: {}]   ;;  %s1706_s11 = inlined_call_operand.vmem [shape: f32[1,64], index: 11, kind: input, shape index: {}]   ;;  %s1707_s12 = inlined_call_operand.vmem [shape: f32[8,8], index: 12, kind: output, shape index: {}]  }
   0x1   :  { %v1166_v0 = vld [vmem:[%s1695_s4 + $0x74] ss:$8 sps:$4 sm:$0xff]   ;;  %v1170_v2 = vld [vmem:[%s1695_s4 + $0x70] ss:$8 sps:$4 sm:$0xff]   ;;  %v1172_v4 = vld [vmem:[%s1695_s4 + $0x64] ss:$8 sps:$4 sm:$0xff]  }
   0x2   :  { %v1168_v1 = vld [vmem:[%s1696_s3 + $0x74] ss:$8 sps:$4 sm:$0xff]   ;;  %222 = vmatprep.subr.bf16.mxu0 %v1166_v0  ;;  %v1171_v3 = vld [vmem:[%s1696_s3 + $0x70] ss:$8 sps:$4 sm:$0xff]   ;;  %v1174_v5 = vld [vmem:[%s1696_s3 + $0x64] ss:$8 sps:$4 sm:$0xff]  }
   0x3   :  { %386 = vmatprep.subr.bf16.mxu1 %v1168_v1  ;;  %223 = vmatpush1.bf16.msra.mxu0 %v1170_v2  ;;  %v1176_v6 = vld [vmem:[%s1695_s4 + $0x60] ss:$8 sps:$4 sm:$0xff]   ;;  %v1178_v8 = vld [vmem:[%s1695_s4 + $0x54] ss:$8 sps:$4 sm:$0xff]   ;;  %v1182_v10 = vld [vmem:[%s1695_s4 + $0x50] ss:$8 sps:$4 sm:$0xff]  }
   0x4   :  { %387 = vmatpush1.bf16.msra.mxu1 %v1171_v3  ;;  %224 = vmatprep.subr.bf16.mxu0 %v1172_v4  ;;  %v1177_v7 = vld [vmem:[%s1696_s3 + $0x60] ss:$8 sps:$4 sm:$0xff]   ;;  %v1180_v9 = vld [vmem:[%s1696_s3 + $0x54] ss:$8 sps:$4 sm:$0xff]   ;;  %v1183_v11 = vld [vmem:[%s1696_s3 + $0x50] ss:$8 sps:$4 sm:$0xff]  }
   0x5   :  { %388 = vmatprep.subr.bf16.mxu1 %v1174_v5  ;;  %v1184_v12 = vld [vmem:[%s1695_s4 + $0x44] ss:$8 sps:$4 sm:$0xff]   ;;  %v1188_v14 = vld [vmem:[%s1695_s4 + $0x40] ss:$8 sps:$4 sm:$0xff]   ;;  %v1190_v16 = vld [vmem:[%s1695_s4 + $0x34] ss:$8 sps:$4 sm:$0xff]  }
   0x6   :  { %v1186_v13 = vld [vmem:[%s1696_s3 + $0x44] ss:$8 sps:$4 sm:$0xff]   ;;  %v1189_v15 = vld [vmem:[%s1696_s3 + $0x40] ss:$8 sps:$4 sm:$0xff]   ;;  %v1192_v17 = vld [vmem:[%s1696_s3 + $0x34] ss:$8 sps:$4 sm:$0xff]  }
   0x7   :  { %225 = vmatpush1.bf16.msra.mxu0 %v1176_v6  ;;  %v1194_v18 = vld [vmem:[%s1695_s4 + $0x30] ss:$8 sps:$4 sm:$0xff]   ;;  %v1196_v20 = vld [vmem:[%s1695_s4 + $0x24] ss:$8 sps:$4 sm:$0xff]   ;;  %v1200_v22 = vld [vmem:[%s1695_s4 + $0x20] ss:$8 sps:$4 sm:$0xff]  }
   0x8   :  { %389 = vmatpush1.bf16.msra.mxu1 %v1177_v7  ;;  %226 = vmatprep.subr.bf16.mxu0 %v1178_v8  ;;  %v1195_v19 = vld [vmem:[%s1696_s3 + $0x30] ss:$8 sps:$4 sm:$0xff]   ;;  %v1198_v21 = vld [vmem:[%s1696_s3 + $0x24] ss:$8 sps:$4 sm:$0xff]   ;;  %v1201_v23 = vld [vmem:[%s1696_s3 + $0x20] ss:$8 sps:$4 sm:$0xff]  }
   0x9   :  { %390 = vmatprep.subr.bf16.mxu1 %v1180_v9  ;;  %v1202_v24 = vld [vmem:[%s1695_s4 + $0x14] ss:$8 sps:$4 sm:$0xff]   ;;  %v1206_v26 = vld [vmem:[%s1695_s4 + $0x10] ss:$8 sps:$4 sm:$0xff]   ;;  %v1208_v28 = vld [vmem:[%s1695_s4 + $0x4] ss:$8 sps:$4 sm:$0xff]  }
   0xa   :  { %v1204_v25 = vld [vmem:[%s1696_s3 + $0x14] ss:$8 sps:$4 sm:$0xff]   ;;  %v1207_v27 = vld [vmem:[%s1696_s3 + $0x10] ss:$8 sps:$4 sm:$0xff]   ;;  %v1210_v29 = vld [vmem:[%s1696_s3 + $0x4] ss:$8 sps:$4 sm:$0xff]  }
   0xb   :  { %227 = vmatpush1.bf16.msra.mxu0 %v1182_v10  ;;  %v1212_v30 = vld [vmem:[%s1695_s4] ss:$8 sps:$4 sm:$0xff]   ;;  %v1214_v32 = vld [vmem:[%s1695_s4 + $0xb4] ss:$8 sps:$4 sm:$0xff]   ;;  %v1218_v34 = vld [vmem:[%s1695_s4 + $0xb0] ss:$8 sps:$4 sm:$0xff]  }
   0xc   :  { %391 = vmatpush1.bf16.msra.mxu1 %v1183_v11  ;;  %228 = vmatprep.subr.bf16.mxu0 %v1184_v12  ;;  %v1213_v31 = vld [vmem:[%s1696_s3] ss:$8 sps:$4 sm:$0xff]   ;;  %v1216_v33 = vld [vmem:[%s1696_s3 + $0xb4] ss:$8 sps:$4 sm:$0xff]   ;;  %v1219_v35 = vld [vmem:[%s1696_s3 + $0xb0] ss:$8 sps:$4 sm:$0xff]  }
   0xd   :  { %392 = vmatprep.subr.bf16.mxu1 %v1186_v13  ;;  %v1220_v36 = vld [vmem:[%s1695_s4 + $0xa4] ss:$8 sps:$4 sm:$0xff]   ;;  %v1224_v42 = vld [vmem:[%s1695_s4 + $0xa0] ss:$8 sps:$4 sm:$0xff]   ;;  %v1226_v44 = vld [vmem:[%s1695_s4 + $0x94] ss:$8 sps:$4 sm:$0xff]  }
   0xe   :  { %v1222_v37 = vld [vmem:[%s1696_s3 + $0xa4] ss:$8 sps:$4 sm:$0xff]   ;;  %v1225_v43 = vld [vmem:[%s1696_s3 + $0xa0] ss:$8 sps:$4 sm:$0xff]   ;;  %v1228_v45 = vld [vmem:[%s1696_s3 + $0x94] ss:$8 sps:$4 sm:$0xff]  }
   0xf   :  { %229 = vmatpush1.bf16.msra.mxu0 %v1188_v14  ;;  %v71_v38 = vld [vmem:[%s1697_s1 + $0x8] sm:$0xff]  ;;  %v1230_v46 = vld [vmem:[%s1695_s4 + $0x90] ss:$8 sps:$4 sm:$0xff]   ;;  %v70_v52 = vld [vmem:[%s1697_s1] sm:$0xff] }
  0x10   :  { %393 = vmatpush1.bf16.msra.mxu1 %v1189_v15  ;;  %230 = vmatprep.subr.bf16.mxu0 %v1190_v16  ;;  %v73_v39 = vpack.c.bf16 %v71_v38, %v71_v38  ;;  %v43_v40 = vld [vmem:[%s1698_s0 + $0x8] sm:$0xff]  ;;  %v1231_v47 = vld [vmem:[%s1696_s3 + $0x90] ss:$8 sps:$4 sm:$0xff]   ;;  %v42_v53 = vld [vmem:[%s1698_s0] sm:$0xff]  ;;  %v72_v56 = vpack.c.bf16 %v70_v52, %v70_v52 }
  0x11   :  { %394 = vmatprep.subr.bf16.mxu1 %v1192_v17  ;;  %v45_v41 = vpack.c.bf16 %v43_v40, %v43_v40  ;;  %v1232_v48 = vld [vmem:[%s1695_s4 + $0x84] ss:$8 sps:$4 sm:$0xff]   ;;  %v1236_v50 = vld [vmem:[%s1695_s4 + $0x80] ss:$8 sps:$4 sm:$0xff]   ;;  %v1240_v54 = vld [vmem:[%s1699_s5 + $0x74] ss:$8 sps:$4 sm:$0xff]   ;;  %v44_v57 = vpack.c.bf16 %v42_v53, %v42_v53 }
  0x12   :  { %1030 = vmatprep.mubr.msk.bf16.mxu0 %vm218_vm0, %v73_v39  ;;  %v1234_v49 = vld [vmem:[%s1696_s3 + $0x84] ss:$8 sps:$4 sm:$0xff]   ;;  %v1237_v51 = vld [vmem:[%s1696_s3 + $0x80] ss:$8 sps:$4 sm:$0xff]   ;;  %v1238_v58 = vld [vmem:[%s1699_s5 + $0x70] ss:$8 sps:$4 sm:$0xff]  }
  0x13   :  { %231 = vmatpush1.bf16.msra.mxu0 %v1194_v18  ;;  %1055 = vmatprep.mubr.msk.bf16.mxu1 %vm218_vm0, %v45_v41  ;;  %v428_v55 = vld [vmem:[%s1700_s2 + $0x8] sm:$0xff]  ;;  %v1246_v62 = vld [vmem:[%s1699_s5 + $0x54] ss:$8 sps:$4 sm:$0xff]   ;;  %v1244_v63 = vld [vmem:[%s1699_s5 + $0x50] ss:$8 sps:$4 sm:$0xff]   ;;  %v600_v41 = vlaneseq }
  0x14   :  { %395 = vmatpush1.bf16.msra.mxu1 %v1195_v19  ;;  %232 = vmatprep.subr.bf16.mxu0 %v1196_v20  ;;  %v430_v59 = vpack.c.bf16 %v428_v55, %v428_v55  ;;  %v1243_v60 = vld [vmem:[%s1699_s5 + $0x64] ss:$8 sps:$4 sm:$0xff]   ;;  %v1241_v61 = vld [vmem:[%s1699_s5 + $0x60] ss:$8 sps:$4 sm:$0xff]   ;;  %v1252_v2 = vld [vmem:[%s1699_s5 + $0x34] ss:$8 sps:$4 sm:$0xff]  }
  0x15   :  { %396 = vmatprep.subr.bf16.mxu1 %v1198_v21  ;;  %v1249_v0 = vld [vmem:[%s1699_s5 + $0x44] ss:$8 sps:$4 sm:$0xff]   ;;  %v1247_v1 = vld [vmem:[%s1699_s5 + $0x40] ss:$8 sps:$4 sm:$0xff]   ;;  %v1250_v3 = vld [vmem:[%s1699_s5 + $0x30] ss:$8 sps:$4 sm:$0xff]  }
  0x16   :  { %v1255_v4 = vld [vmem:[%s1699_s5 + $0x24] ss:$8 sps:$4 sm:$0xff]   ;;  %v1253_v5 = vld [vmem:[%s1699_s5 + $0x20] ss:$8 sps:$4 sm:$0xff]   ;;  %v1258_v6 = vld [vmem:[%s1699_s5 + $0x14] ss:$8 sps:$4 sm:$0xff]  }
  0x17   :  { %233 = vmatpush1.bf16.msra.mxu0 %v1200_v22  ;;  %v1256_v7 = vld [vmem:[%s1699_s5 + $0x10] ss:$8 sps:$4 sm:$0xff]   ;;  %v1261_v8 = vld [vmem:[%s1699_s5 + $0x4] ss:$8 sps:$4 sm:$0xff]   ;;  %v1259_v9 = vld [vmem:[%s1699_s5] ss:$8 sps:$4 sm:$0xff]  }
  0x18   :  { %397 = vmatpush1.bf16.msra.mxu1 %v1201_v23  ;;  %234 = vmatprep.subr.bf16.mxu0 %v1202_v24  ;;  %v1264_v10 = vld [vmem:[%s1699_s5 + $0x94] ss:$8 sps:$4 sm:$0xff]   ;;  %v1262_v11 = vld [vmem:[%s1699_s5 + $0x90] ss:$8 sps:$4 sm:$0xff]   ;;  %v1267_v12 = vld [vmem:[%s1699_s5 + $0x84] ss:$8 sps:$4 sm:$0xff]  }
  0x19   :  { %398 = vmatprep.subr.bf16.mxu1 %v1204_v25  ;;  %v1265_v13 = vld [vmem:[%s1699_s5 + $0x80] ss:$8 sps:$4 sm:$0xff]   ;;  %v1268_v16 = vld [vmem:[%s1701_s7 + $0x78] sm:$0xff]   ;;  %v1270_v18 = vld [vmem:[%s1701_s7 + $0x70] sm:$0xff]  }
  0x1a   :  { %v427_v14 = vld [vmem:[%s1700_s2] sm:$0xff]  ;;  %v1269_v17 = vld [vmem:[%s1701_s7 + $0x38] sm:$0xff]   ;;  %v1271_v19 = vld [vmem:[%s1701_s7 + $0x30] sm:$0xff]  }
  0x1b   :  { %235 = vmatpush1.bf16.msra.mxu0 %v1206_v26  ;;  %v429_v15 = vpack.c.bf16 %v427_v14, %v427_v14  ;;  %v1272_v20 = vld [vmem:[%s1701_s7 + $0x68] sm:$0xff]   ;;  %v1274_v22 = vld [vmem:[%s1701_s7 + $0x60] sm:$0xff]   ;;  %v1276_v24 = vld [vmem:[%s1701_s7 + $0x58] sm:$0xff]  }
  0x1c   :  { %399 = vmatpush1.bf16.msra.mxu1 %v1207_v27  ;;  %236 = vmatprep.subr.bf16.mxu0 %v1208_v28  ;;  %v1273_v21 = vld [vmem:[%s1701_s7 + $0x28] sm:$0xff]   ;;  %v1275_v23 = vld [vmem:[%s1701_s7 + $0x20] sm:$0xff]   ;;  %v1277_v25 = vld [vmem:[%s1701_s7 + $0x18] sm:$0xff]  }
  0x1d   :  { %400 = vmatprep.subr.bf16.mxu1 %v1210_v29  ;;  %v1278_v26 = vld [vmem:[%s1701_s7 + $0x50] sm:$0xff]   ;;  %v1280_v28 = vld [vmem:[%s1701_s7 + $0x48] sm:$0xff]  }
  0x1e   :  { %v1279_v27 = vld [vmem:[%s1701_s7 + $0x10] sm:$0xff]   ;;  %v1281_v29 = vld [vmem:[%s1701_s7 + $0x8] sm:$0xff]  }
  0x1f   :  { %237 = vmatpush1.bf16.msra.mxu0 %v1212_v30  ;;  %v1282_v30 = vld [vmem:[%s1701_s7 + $0x40] sm:$0xff]  }
  0x20   :  { %401 = vmatpush1.bf16.msra.mxu1 %v1213_v31  ;;  %246 = vmatprep.subr.bf16.mxu0 %v1214_v32  ;;  %v1283_v31 = vld [vmem:[%s1701_s7] sm:$0xff]   ;;  %v1296_v32 = vmov 0.0  }
  0x21   :  { %410 = vmatprep.subr.bf16.mxu1 %v1216_v33 }
  0x23   :  { %247 = vmatpush2.bf16.msra.mxu0 %v1218_v34 }
  0x24   :  { %411 = vmatpush2.bf16.msra.mxu1 %v1219_v35  ;;  %248 = vmatprep.subr.bf16.mxu0 %v1220_v36 }
  0x25   :  { %412 = vmatprep.subr.bf16.mxu1 %v1222_v37 }
  0x27   :  { %249 = vmatpush2.bf16.msra.mxu0 %v1224_v42  ;;  %v1637_v42 = vshrl.u32 %v600_v41, 7 }
  0x28   :  { %413 = vmatpush2.bf16.msra.mxu1 %v1225_v43  ;;  %250 = vmatprep.subr.bf16.mxu0 %v1226_v44  ;;  %v598_v44 = vld [vmem:[%s1703_s6] sm:$0x3] }
  0x29   :  { %414 = vmatprep.subr.bf16.mxu1 %v1228_v45  ;;  %v602_v43 = vsub.s32 0, %v1637_v42  ;;  %v606_v45 = vsub.s32 1, %v1637_v42 }
  0x2b   :  { %251 = vmatpush2.bf16.msra.mxu0 %v1230_v46 }
  0x2c   :  { %415 = vmatpush2.bf16.msra.mxu1 %v1231_v47  ;;  %252 = vmatprep.subr.bf16.mxu0 %v1232_v48  ;;  %v603_v47 = vrot.slane %v598_v44, %v602_v43 }
  0x2d   :  { %416 = vmatprep.subr.bf16.mxu1 %v1234_v49 }
  0x2f   :  { %253 = vmatpush2.bf16.msra.mxu0 %v1236_v50 }
  0x30   :  { %417 = vmatpush2.bf16.msra.mxu1 %v1237_v51  ;;  %555 = vmatprep.subr.bf16.mxu0 %v1240_v54  ;;  %v607_v51 = vrot.slane %v598_v44, %v606_v45 }
  0x31   :  { %1106 = vmatprep.subr.bf16.mxu1 %v1268_v16 }
  0x32   :  { %255 = vmatmul.mubr.bf16.vlgmr.msra.gmra.mxu0 %v72_v56 }
  0x33   :  { %419 = vmatmul.mubr.bf16.vlgmr.msra.gmra.mxu1 %v44_v57  ;;  %556 = vmatpush1.bf16.msra.mxu0 %v1238_v58 }
  0x34   :  { %1076 = vmatprep.mubr.msk.bf16.mxu0 %vm551_vm1, %v430_v59  ;;  %557 = vmatprep.subr.bf16.mxu0 %v1243_v60 }
  0x35   :  { %1107 = vmatpush3.bf16.msra.mxu1 %v1269_v17 }
  0x36   :  { %1108 = vmatprep.subr.bf16.mxu1 %v1270_v18  ;;  %v1094_v18 = vld [vmem:[%s1705_s10] ss:$0 sm:$0xff] }
  0x37   :  { %558 = vmatpush1.bf16.msra.mxu0 %v1241_v61 }
  0x38   :  { %559 = vmatprep.subr.bf16.mxu0 %v1246_v62 }
  0x39   :  { %1109 = vmatpush3.bf16.msra.mxu1 %v1271_v19 }
  0x3a   :  { %1110 = vmatprep.subr.bf16.mxu1 %v1272_v20 }
  0x3b   :  { %560 = vmatpush1.bf16.msra.mxu0 %v1244_v63  ;;  %v1284_v63 = vld [vmem:[%s1702_s9 + $0x38] sm:$0xff]  }
  0x3c   :  { %561 = vmatprep.subr.bf16.mxu0 %v1249_v0 }
  0x3d   :  { %1111 = vmatpush3.bf16.msra.mxu1 %v1273_v21 }
  0x3e   :  { %1112 = vmatprep.subr.bf16.mxu1 %v1274_v22 }
  0x3f   :  { %562 = vmatpush1.bf16.msra.mxu0 %v1247_v1  ;;  %v1285_v1 = vld [vmem:[%s1702_s9 + $0x30] sm:$0xff]  }
  0x40   :  { %563 = vmatprep.subr.bf16.mxu0 %v1252_v2  ;;  %v1286_v2 = vld [vmem:[%s1702_s9 + $0x28] sm:$0xff]  }
  0x41   :  { %1113 = vmatpush3.bf16.msra.mxu1 %v1275_v23 }
  0x42   :  { %1114 = vmatprep.subr.bf16.mxu1 %v1276_v24 }
  0x43   :  { %564 = vmatpush1.bf16.msra.mxu0 %v1250_v3  ;;  %v1287_v3 = vld [vmem:[%s1702_s9 + $0x20] sm:$0xff]  }
  0x44   :  { %565 = vmatprep.subr.bf16.mxu0 %v1255_v4  ;;  %v1288_v4 = vld [vmem:[%s1702_s9 + $0x18] sm:$0xff]  }
  0x45   :  { %1115 = vmatpush3.bf16.msra.mxu1 %v1277_v25 }
  0x46   :  { %1116 = vmatprep.subr.bf16.mxu1 %v1278_v26  ;;  %v913_v26 = vld [vmem:[%s1706_s11] sm:$0x1] }
  0x47   :  { %566 = vmatpush1.bf16.msra.mxu0 %v1253_v5  ;;  %v1289_v5 = vld [vmem:[%s1702_s9 + $0x10] sm:$0xff]  }
  0x48   :  { %567 = vmatprep.subr.bf16.mxu0 %v1258_v6  ;;  %v1290_v6 = vld [vmem:[%s1702_s9 + $0x8] sm:$0xff]  }
  0x49   :  { %1117 = vmatpush3.bf16.msra.mxu1 %v1279_v27 }
  0x4a   :  { %1118 = vmatprep.subr.bf16.mxu1 %v1280_v28 }
  0x4b   :  { %568 = vmatpush1.bf16.msra.mxu0 %v1256_v7  ;;  %v1291_v7 = vld [vmem:[%s1702_s9] sm:$0xff]  }
  0x4c   :  { %569 = vmatprep.subr.bf16.mxu0 %v1261_v8 }
  0x4d   :  { %1119 = vmatpush3.bf16.msra.mxu1 %v1281_v29 }
  0x4e   :  { %1120 = vmatprep.subr.bf16.mxu1 %v1282_v30 }
  0x4f   :  { %570 = vmatpush1.bf16.msra.mxu0 %v1259_v9  ;;  %v1077_v9 = vld [vmem:[%s1704_s8] ss:$0 sm:$0xff] }
  0x50   :  { %583 = vmatprep.subr.bf16.mxu0 %v1264_v10 }
  0x51   :  { %1121 = vmatpush3.bf16.msra.mxu1 %v1283_v31 }
  0x52   :  { %1139 = vmatprep.subr.bf16.mxu1 %v1296_v32 }
  0x53   :  { %584 = vmatpush2.bf16.msra.mxu0 %v1262_v11 }
  0x54   :  { %585 = vmatprep.subr.bf16.mxu0 %v1267_v12 }
  0x57   :  { %586 = vmatpush2.bf16.msra.mxu0 %v1265_v13 }
  0x58   :  { %1159 = vmatprep.subr.mxu0 %v1296_v32 }
  0x5a   :  { %588 = vmatmul.mubr.bf16.vlgmr.msra.gmra.mxu0 %v429_v15 }
  0x5b   :  { %1161 = vmatprep.mubr.msk.f32.mxu0 %vm1297_vm4, %v1296_v32 }
  0xf2   :  { %v256_v33 = vpop.f32.mrf.mxu0 }
  0xf3   :  { %v420_v34 = vpop.f32.mrf.mxu1 }
  0xf4   :  { %v258_v35 = vpop.f32.mrf.mxu0  ;;  %v421_v46 = vadd.f32 %v420_v34, %v256_v33 }
  0xf5   :  { %v422_v36 = vpop.f32.mrf.mxu1 }
  0xf6   :  { %v260_v37 = vpop.f32.mrf.mxu0  ;;  %v423_v49 = vadd.f32 %v422_v36, %v258_v35 }
  0xf7   :  { %v424_v38 = vpop.f32.mrf.mxu1 }
  0xf8   :  { %v261_v39 = vpop.f32.mrf.mxu0 }
  0xf9   :  { %v425_v40 = vpop.f32.mrf.mxu1 }
 0x11a   :  { %v589_v48 = vpop.f32.mrf.mxu0 }
 0x11b   :  { %v596_v50 = vadd.f32 %v589_v48, %v421_v46 }
 0x11c   :  { %v591_v52 = vpop.f32.mrf.mxu0 }
 0x11d   :  { %v610_v53 = vadd.f32 %v603_v47, %v596_v50  ;;  %v597_v54 = vadd.f32 %v591_v52, %v423_v49 }
 0x11e   :  { %v593_v55 = vpop.f32.mrf.mxu0 }
 0x11f   :  { %vm612_vm2 = vcmp.gt.f32.partialorder %v610_v53, 0.0  ;;  %v614_v56 = vmul.f32 0.3, %v610_v53  ;;  %v611_v57 = vadd.f32 %v607_v51, %v597_v54 }
 0x120   :  { %v594_v58 = vpop.f32.mrf.mxu0 }
 0x121   :  { %v615_v59 = vmul.f32 0.3, %v611_v57  ;;  %vm613_vm3 = vcmp.gt.f32.partialorder %v611_v57, 0.0  ;;  %v616_v60 = vsel %vm612_vm2, %v610_v53, %v614_v56 }
 0x122   :  { %v618_v0 = vpack.c.bf16 %v616_v60, %v616_v60 }
 0x123   :  { %v617_v61 = vsel %vm613_vm3, %v611_v57, %v615_v59 }
 0x124   :  { %v619_v62 = vpack.c.bf16 %v617_v61, %v617_v61 }
 0x126   :  { %787 = vmatprep.mubr.bf16.mxu1 %v619_v62 }
 0x127   :  { %788 = vmatmul.mubr.bf16.vlgmr.msra.gmra.mxu1 %v618_v0 }
 0x128   :  { %1140 = vmatpush3.bf16.msra.mxu1 %v1284_v63  ;;  %1155 = vmatprep.mubr.msk.bf16.mxu1 %vm1297_vm4, %v1296_v32 }
 0x129   :  { %1141 = vmatprep.subr.bf16.mxu1 %v1296_v32 }
 0x12c   :  { %1142 = vmatpush3.bf16.msra.mxu1 %v1285_v1 }
 0x12d   :  { %1143 = vmatprep.subr.bf16.mxu1 %v1296_v32 }
 0x130   :  { %1144 = vmatpush3.bf16.msra.mxu1 %v1286_v2 }
 0x131   :  { %1145 = vmatprep.subr.bf16.mxu1 %v1296_v32 }
 0x134   :  { %1146 = vmatpush3.bf16.msra.mxu1 %v1287_v3 }
 0x135   :  { %1147 = vmatprep.subr.bf16.mxu1 %v1296_v32 }
 0x138   :  { %1148 = vmatpush3.bf16.msra.mxu1 %v1288_v4 }
 0x139   :  { %1149 = vmatprep.subr.bf16.mxu1 %v1296_v32 }
 0x13c   :  { %1150 = vmatpush3.bf16.msra.mxu1 %v1289_v5 }
 0x13d   :  { %1151 = vmatprep.subr.bf16.mxu1 %v1296_v32 }
 0x140   :  { %1152 = vmatpush3.bf16.msra.mxu1 %v1290_v6 }
 0x141   :  { %1153 = vmatprep.subr.bf16.mxu1 %v1296_v32 }
 0x144   :  { %1154 = vmatpush3.bf16.msra.mxu1 %v1291_v7 }
 0x1e7   :  { %v1122_v8 = vpop.f32.mrf.mxu1 }
 0x1e9   :  { %v1123_v10 = vpop.f32.mrf.mxu1 }
 0x1ea   :  { %v1124_v11 = vadd.f32 %v1123_v10, %v1122_v8 }
 0x1eb   :  { %v1125_v12 = vpop.f32.mrf.mxu1 }
 0x1ec   :  { %v790_v13 = vadd.f32 %v1124_v11, %v1077_v9 }
 0x1ed   :  { %v1126_v14 = vpop.f32.mrf.mxu1 }
 0x1ee   :  { %vm795_vm5 = vcmp.gt.f32.partialorder %v790_v13, 0.0  ;;  %v796_v15 = vmul.f32 0.3, %v790_v13 }
 0x1f0   :  { %v797_v16 = vsel %vm795_vm5, %v790_v13, %v796_v15 }
 0x1f1   :  { %v798_v17 = vpack.c.bf16 %v797_v16, %v797_v16 }
 0x1f3   :  { %1156 = vmatmul.mubr.bf16.vlgmr.msra.gmra.mxu1 %v798_v17 }
 0x2b3   :  { %v904_v19 = vpop.f32.mrf.mxu1 }
 0x2b4   :  { %v905_v20 = vadd.f32 %v1094_v18, %v904_v19 }
 0x2b5   :  { %v1157_v21 = vpop.f32.mrf.mxu1 }
 0x2b6   :  { %vm910_vm6 = vcmp.gt.f32.partialorder %v905_v20, 0.0  ;;  %v911_v22 = vmul.f32 0.3, %v905_v20 }
 0x2b7   :  { %v907_v23 = vpop.f32.mrf.mxu1 }
 0x2b8   :  { %v912_v24 = vsel %vm910_vm6, %v905_v20, %v911_v22 }
 0x2b9   :  { %v1158_v25 = vpop.f32.mrf.mxu1  ;;  %1160 = vmatpush3.xpose.msk.msra.mxu0 %vm218_vm0, %v912_v24 }
 0x2bc   :  { %1162 = vmatmul.mubr.msk.f32.vlgmr.msra.gmra.mxu0 %vm218_vm0, %v913_v26 }
 0x37c   :  { %v986_v27 = vpop.f32.mrf.mxu0 }
 0x37d   :  { %v1105_v28 = vmul.f32 -1.442695, %v986_v27 }
 0x37e   :  { %v1163_v29 = vpop.f32.mrf.mxu0 }
 0x37f   :  { %1292 = vpow2.f32 %v1105_v28 }
 0x38c   :  { %v1293_v30 = vpop.eup %1292 }
 0x38d   :  { %v993_v31 = vadd.f32 1.0, %v1293_v30 }
 0x38f   :  { %1294 = vrcp.f32 %v993_v31 }
 0x39c   :  { %v1295_v32 = vpop.eup %1294 }
 0x39d   :  { %v999_v33 = vrot.slane %v1295_v32, %v602_v43 }
 0x39f   :  { %1001 = vst.msk [vmem:[%s1707_s12] sm:$0xff] %vm1000_vm7, %v999_v33 }

</bundles_post_ra>
